<compile_context>
chip_gen: v7x
topology: tpu7x:2x2x1
jax: 0.10.0
libtpu: 0.0.40
codegen_flags: <defaults>
</compile_context>

<pallas_src>
import functools
import math

import jax
import jax.numpy as jnp
from jax import lax
from jax.experimental import pallas as pl
from jax.experimental.pallas import tpu as pltpu

AUTOREGRESSIVE_SCALAR = 0.5
TEMP = 0.25
EPS = 1e-7
# logit(sigmoid(s)) with the EPS guards is ~identity but saturates at
# +/- log((1+eps)/eps); keep that clip to match the reference in the
# saturated regime while dropping the exp/log/log chain.
LOGIT_CLIP = math.log((1.0 + EPS) / EPS)

HID_PAD = 128   # lane-dense padded hidden width (nhid -> 128)
CLS_PAD = 128   # lane-dense padded class width  (nclass -> 128)


def _dot(a, b):
    # MXU matmul: bf16 operands, f32 accumulation.
    return jnp.dot(a.astype(jnp.bfloat16), b.astype(jnp.bfloat16),
                   preferred_element_type=jnp.float32)


def hallucigraph_kernel(
    x_ref, adj_ref, noise_ref,            # VMEM bf16 [N,Fp], bf16 [N,N], f32 [N,N]
    w_gc1_ref, w_gc2_ref, w_gc3_ref,
    w_gd1_ref, w_gd2_ref, w_gd3_ref,      # VMEM bf16, padded to 128 lanes
    scores_ref, logp_ref,                 # VMEM f32 [N,N], [N,CLS_PAD]
    adj_rec_ref, deg_ref,                 # VMEM scratch f32 [N,N], [N,1]
    *, nclass, row_chunk,
):
    n = adj_ref.shape[0]
    x = x_ref[...]          # bf16
    adj = adj_ref[...]      # bf16

    # ---- encode: z0 = gc2(gc1(x, adj), adj) ------------------------------
    h1 = jnp.maximum(_dot(adj, _dot(x, w_gc1_ref[...])), 0.0)     # relu, f32
    z0 = _dot(adj, _dot(h1, w_gc2_ref[...]))                      # identity act

    # ---- adj_scores = z0 @ z0.T (rhs contracted on its minor dim ->
    #      MXU transposed weight load; same dot_general as pl.dot trans_b) --
    z0_bf = z0.astype(jnp.bfloat16)
    scores = lax.dot_general(
        z0_bf, z0_bf, dimension_numbers=(((1,), (1,)), ((), ())),
        preferred_element_type=jnp.float32)
    scores_ref[...] = scores

    # ---- sample_graph(sigmoid(scores), temp, hard=False), row-chunked ----
    # logit(sigmoid(s)) == s up to the EPS-induced clip -> just clip.
    num_chunks = n // row_chunk

    def body(i, carry):
        r0 = i * row_chunk
        s = scores_ref[pl.ds(r0, row_chunk), :]                   # f32 slab
        logits = jnp.clip(s, -LOGIT_CLIP, LOGIT_CLIP)
        t = (logits + noise_ref[pl.ds(r0, row_chunk), :]) * (1.0 / TEMP)
        a = 0.5 * (1.0 + jnp.tanh(0.5 * t))                       # sigmoid, 1 EUP op
        adj_rec_ref[pl.ds(r0, row_chunk), :] = a
        deg_ref[pl.ds(r0, row_chunk), :] = jnp.sum(a, axis=1, keepdims=True)
        return carry

    lax.fori_loop(0, num_chunks, body, 0)

    # ---- normalize_adj folded into the propagation ------------------------
    deg = deg_ref[...]                                            # [N,1] f32
    d = jnp.where(deg > 0.0, lax.rsqrt(deg), 0.0)                 # D^{-1/2}
    adj_rec = adj_rec_ref[...].astype(jnp.bfloat16)               # [N,N] bf16

    def norm_prop(m):
        # adj_norm @ m  ==  d * (adj_rec @ (d * m));  adj_norm never built.
        return d * jnp.dot(adj_rec, (d * m).astype(jnp.bfloat16),
                           preferred_element_type=jnp.float32)

    # ---- decoder convs: gd1/gd2 fused into one wide propagation ----------
    c = jnp.concatenate(
        [_dot(z0, w_gd1_ref[...]), _dot(x, w_gd2_ref[...])], axis=1)  # [N,2H]
    t12 = norm_prop(c)
    z12 = (jnp.maximum(t12[:, :HID_PAD], 0.0) +
           jnp.maximum(t12[:, HID_PAD:], 0.0))                    # relu(z1)+relu(z2)
    z3 = norm_prop(_dot(z12, w_gd3_ref[...]))                     # gd3 identity

    z = (1.0 - AUTOREGRESSIVE_SCALAR) * z0 + AUTOREGRESSIVE_SCALAR * z3

    # ---- preds = gc3(z, adj), log_softmax over the real classes ----------
    preds = _dot(adj, _dot(z, w_gc3_ref[...]))                    # [N, CLS_PAD]
    col = lax.broadcasted_iota(jnp.int32, preds.shape, 1)
    preds = jnp.where(col < nclass, preds, -1e30)                 # mask pad lanes
    m = jnp.max(preds, axis=1, keepdims=True)
    shifted = preds - m
    lse = jnp.log(jnp.sum(jnp.exp(shifted), axis=1, keepdims=True))
    logp_ref[...] = shifted - lse


def _pad_to(w, rows, cols):
    r, c = w.shape
    return jnp.pad(w, ((0, rows - r), (0, cols - c)))


def _round_up(v, m):
    return ((v + m - 1) // m) * m


def _pick_row_chunk(n):
    if n <= 256:
        return n
    for c in (256, 128, 64, 32, 16, 8):
        if n % c == 0:
            return c
    return n


def hallucigraph_forward(x, adj, noise_key, weights):
    n, nfeat = x.shape
    nclass = weights["gc3"].shape[1]
    feat_pad = _round_up(nfeat, 128)
    row_chunk = _pick_row_chunk(n)

    # pad feature / hidden / class dims to 128 lanes; cast MXU operands to bf16
    wp = {
        "gc1": _pad_to(weights["gc1"], feat_pad, HID_PAD),
        "gc2": _pad_to(weights["gc2"], HID_PAD, HID_PAD),
        "gc3": _pad_to(weights["gc3"], HID_PAD, CLS_PAD),
        "gd1": _pad_to(weights["gd1"], HID_PAD, HID_PAD),
        "gd2": _pad_to(weights["gd2"], feat_pad, HID_PAD),
        "gd3": _pad_to(weights["gd3"], HID_PAD, HID_PAD),
    }
    wp = {k: v.astype(jnp.bfloat16) for k, v in wp.items()}
    x_bf = jnp.pad(x, ((0, 0), (0, feat_pad - nfeat))).astype(jnp.bfloat16)
    adj_bf = adj.astype(jnp.bfloat16)

    # logistic noise for the binary-concrete sample, generated host-side
    # (the TPU HW PRNG primitive has no interpret/CPU lowering).
    u = jax.random.uniform(noise_key, (n, n), dtype=jnp.float32)
    lnoise = jnp.log(u + EPS) - jnp.log(1.0 - u + EPS)

    vmem = pl.BlockSpec(memory_space=pltpu.MemorySpace.VMEM)

    # size the scoped VMEM limit from the resident footprint, clamped to the
    # chip's real capacity (v7x is 64 MiB/TC, not 128 MiB).
    f32, bf16 = 4, 2
    w_bytes = sum(int(v.size) for v in wp.values()) * bf16
    footprint = (
        n * n * bf16                         # adj
        + n * n * f32 * 3                    # noise, scores out, adj_rec scratch
        + n * feat_pad * bf16                # x
        + w_bytes
        + n * row_chunk * f32 * 4            # per-chunk elementwise temporaries
        + n * (2 * HID_PAD) * f32 * 6        # dense activations (z0, h1, c, ...)
        + n * CLS_PAD * f32 * 2)             # preds / logp
    try:
        chip_vmem = int(pltpu.get_tpu_info().vmem_capacity_bytes)
    except Exception:
        chip_vmem = 64 * 1024 * 1024         # v7x per-TC size; safe everywhere
    cap = (chip_vmem * 7) // 8               # headroom for Mosaic internal scratch
    vmem_limit = int(min(cap, max(32 * 1024 * 1024, 2 * footprint)))

    nn = n * n
    flops = 2 * (nn * (6 * HID_PAD + CLS_PAD)
                 + n * HID_PAD * (2 * feat_pad + 3 * HID_PAD + CLS_PAD))
    cost = pl.CostEstimate(
        flops=int(flops),
        transcendentals=int(nn + n * CLS_PAD),
        bytes_accessed=int(nn * bf16 + nn * f32            # adj in, noise in
                           + n * feat_pad * bf16 + w_bytes
                           + nn * f32 + n * CLS_PAD * f32))  # outputs

    scores, logp = pl.pallas_call(
        functools.partial(hallucigraph_kernel, nclass=nclass, row_chunk=row_chunk),
        out_shape=(
            jax.ShapeDtypeStruct((n, n), jnp.float32),        # adj_scores
            jax.ShapeDtypeStruct((n, CLS_PAD), jnp.float32),  # padded log_softmax
        ),
        in_specs=[vmem] * 9,
        out_specs=(vmem, vmem),
        scratch_shapes=[
            pltpu.VMEM((n, n), jnp.float32),   # adj_rec
            pltpu.VMEM((n, 1), jnp.float32),   # row degrees
        ],
        compiler_params=pltpu.CompilerParams(vmem_limit_bytes=vmem_limit),
        cost_estimate=cost,
    )(x_bf, adj_bf, lnoise,
      wp["gc1"], wp["gc2"], wp["gc3"], wp["gd1"], wp["gd2"], wp["gd3"])

    return scores, logp[:, :nclass]


def init_weights(key, nfeat, nhid, nclass):
    # pygcn GraphConvolution.reset_parameters: uniform(-stdv, stdv),
    # stdv = 1 / sqrt(out_features)
    shapes = {
        "gc1": (nfeat, nhid),
        "gc2": (nhid, nhid),
        "gc3": (nhid, nclass),
        "gd1": (nhid, nhid),
        "gd2": (nfeat, nhid),
        "gd3": (nhid, nhid),
        # gd4 / dc exist in __init__ but are unused by forward()
    }
    weights = {}
    keys = jax.random.split(key, len(shapes))
    for k, (name, shp) in zip(keys, sorted(shapes.items())):
        stdv = 1.0 / math.sqrt(shp[1])
        weights[name] = jax.random.uniform(
            k, shp, dtype=jnp.float32, minval=-stdv, maxval=stdv)
    return weights


if __name__ == "__main__":
    N, NFEAT, NHID, NCLASS = 16, 8, 32, 4

    key = jax.random.PRNGKey(0)
    kx, kadj, kw, knoise = jax.random.split(key, 4)

    x = jax.random.normal(kx, (N, NFEAT), dtype=jnp.float32)

    # symmetric normalized random adjacency with self-loops
    a = (jax.random.uniform(kadj, (N, N)) > 0.7).astype(jnp.float32)
    a = jnp.maximum(a, a.T) + jnp.eye(N, dtype=jnp.float32)
    deg = jnp.sum(a, axis=1, keepdims=True)
    dinv = jnp.where(deg > 0, 1.0 / jnp.sqrt(deg), 0.0)
    adj = dinv * a * dinv.T

    weights = init_weights(kw, NFEAT, NHID, NCLASS)

    adj_scores, log_preds = hallucigraph_forward(x, adj, knoise, weights)
    jax.block_until_ready((adj_scores, log_preds))

    assert adj_scores.shape == (N, N)
    assert log_preds.shape == (N, NCLASS)
    assert bool(jnp.all(jnp.isfinite(adj_scores)))
    assert bool(jnp.all(jnp.isfinite(log_preds)))
    # log_softmax rows should (log-)sum to ~0
    assert bool(jnp.allclose(
        jnp.sum(jnp.exp(log_preds), axis=1), 1.0, atol=1e-4))

    print("KERNEL_OK")
</pallas_src>

<mosaic_0001>
module attributes {stable_mosaic.version = 11 : i64} {
  func.func @hallucigraph_kernel(%arg0: memref<16x128xbf16, #tpu.memory_space<vmem>>, %arg1: memref<16x16xbf16, #tpu.memory_space<vmem>>, %arg2: memref<16x16xf32, #tpu.memory_space<vmem>>, %arg3: memref<128x128xbf16, #tpu.memory_space<vmem>>, %arg4: memref<128x128xbf16, #tpu.memory_space<vmem>>, %arg5: memref<128x128xbf16, #tpu.memory_space<vmem>>, %arg6: memref<128x128xbf16, #tpu.memory_space<vmem>>, %arg7: memref<128x128xbf16, #tpu.memory_space<vmem>>, %arg8: memref<128x128xbf16, #tpu.memory_space<vmem>>, %arg9: memref<16x16xf32, #tpu.memory_space<vmem>>, %arg10: memref<16x128xf32, #tpu.memory_space<vmem>>, %arg11: memref<16x16xf32, #tpu.memory_space<vmem>>, %arg12: memref<16x1xf32, #tpu.memory_space<vmem>>) attributes {dimension_semantics = [], scalar_prefetch = 0 : i64, scratch_operands = 2 : i64, tpu.core_type = #tpu.core_type<tc>} {
    %c0 = arith.constant 0 : index
    %c0_0 = arith.constant 0 : index
    %0 = vector.load %arg0[%c0, %c0_0] : memref<16x128xbf16, #tpu.memory_space<vmem>>, vector<16x128xbf16>
    %c0_1 = arith.constant 0 : index
    %c0_2 = arith.constant 0 : index
    %1 = vector.load %arg1[%c0_1, %c0_2] : memref<16x16xbf16, #tpu.memory_space<vmem>>, vector<16x16xbf16>
    %c0_3 = arith.constant 0 : index
    %c0_4 = arith.constant 0 : index
    %2 = vector.load %arg3[%c0_3, %c0_4] : memref<128x128xbf16, #tpu.memory_space<vmem>>, vector<128x128xbf16>
    %cst = arith.constant dense<0.000000e+00> : vector<16x128xf32>
    %3 = tpu.matmul %0, %2, %cst {dimension_numbers = #tpu.dot_dimension_numbers<[1], [0], [0], [1], [0, 0, 1, 1], [], []>} : vector<16x128xbf16>, vector<128x128xbf16>, vector<16x128xf32> -> vector<16x128xf32>
    %4 = arith.truncf %3 : vector<16x128xf32> to vector<16x128xbf16>
    %cst_5 = arith.constant dense<0.000000e+00> : vector<16x128xf32>
    %5 = tpu.matmul %1, %4, %cst_5 {dimension_numbers = #tpu.dot_dimension_numbers<[1], [0], [0], [1], [0, 0, 1, 1], [], []>} : vector<16x16xbf16>, vector<16x128xbf16>, vector<16x128xf32> -> vector<16x128xf32>
    %cst_6 = arith.constant 0.000000e+00 : f32
    %6 = vector.broadcast %cst_6 : f32 to vector<16x128xf32>
    %7 = arith.maximumf %5, %6 : vector<16x128xf32>
    %c0_7 = arith.constant 0 : index
    %c0_8 = arith.constant 0 : index
    %8 = vector.load %arg4[%c0_7, %c0_8] : memref<128x128xbf16, #tpu.memory_space<vmem>>, vector<128x128xbf16>
    %9 = arith.truncf %7 : vector<16x128xf32> to vector<16x128xbf16>
    %cst_9 = arith.constant dense<0.000000e+00> : vector<16x128xf32>
    %10 = tpu.matmul %9, %8, %cst_9 {dimension_numbers = #tpu.dot_dimension_numbers<[1], [0], [0], [1], [0, 0, 1, 1], [], []>} : vector<16x128xbf16>, vector<128x128xbf16>, vector<16x128xf32> -> vector<16x128xf32>
    %11 = arith.truncf %10 : vector<16x128xf32> to vector<16x128xbf16>
    %cst_10 = arith.constant dense<0.000000e+00> : vector<16x128xf32>
    %12 = tpu.matmul %1, %11, %cst_10 {dimension_numbers = #tpu.dot_dimension_numbers<[1], [0], [0], [1], [0, 0, 1, 1], [], []>} : vector<16x16xbf16>, vector<16x128xbf16>, vector<16x128xf32> -> vector<16x128xf32>
    %13 = arith.truncf %12 : vector<16x128xf32> to vector<16x128xbf16>
    %cst_11 = arith.constant dense<0.000000e+00> : vector<16x16xf32>
    %14 = tpu.matmul %13, %13, %cst_11 {dimension_numbers = #tpu.dot_dimension_numbers<[1], [1], [0], [0], [0, 0, 1, 0], [], []>} : vector<16x128xbf16>, vector<16x128xbf16>, vector<16x16xf32> -> vector<16x16xf32>
    %c0_12 = arith.constant 0 : index
    %c0_13 = arith.constant 0 : index
    %15 = vector.load %arg9[%c0_12, %c0_13] : memref<16x16xf32, #tpu.memory_space<vmem>>, vector<16x16xf32>
    tpu.vector_store %arg9[%c0_12, %c0_13], %14 {strides = array<i32>} : memref<16x16xf32, #tpu.memory_space<vmem>>, vector<16x16xf32>,
    %c0_i32 = arith.constant 0 : i32
    %c16_i32 = arith.constant 16 : i32
    %16 = arith.muli %c0_i32, %c16_i32 : i32
    %17 = arith.index_cast %16 : i32 to index
    %c0_14 = arith.constant 0 : index
    %18 = vector.load %arg9[%17, %c0_14] : memref<16x16xf32, #tpu.memory_space<vmem>>, vector<16x16xf32>
    %cst_15 = arith.constant -16.1180954 : f32
    %cst_16 = arith.constant 16.1180954 : f32
    %19 = vector.broadcast %cst_15 : f32 to vector<16x16xf32>
    %20 = arith.maximumf %19, %18 : vector<16x16xf32>
    %21 = vector.broadcast %cst_16 : f32 to vector<16x16xf32>
    %22 = arith.minimumf %21, %20 : vector<16x16xf32>
    %23 = arith.index_cast %16 : i32 to index
    %c0_17 = arith.constant 0 : index
    %24 = vector.load %arg2[%23, %c0_17] : memref<16x16xf32, #tpu.memory_space<vmem>>, vector<16x16xf32>
    %25 = arith.addf %22, %24 : vector<16x16xf32>
    %cst_18 = arith.constant 4.000000e+00 : f32
    %26 = vector.broadcast %cst_18 : f32 to vector<16x16xf32>
    %27 = arith.mulf %25, %26 : vector<16x16xf32>
    %cst_19 = arith.constant 5.000000e-01 : f32
    %28 = vector.broadcast %cst_19 : f32 to vector<16x16xf32>
    %29 = arith.mulf %28, %27 : vector<16x16xf32>
    %30 = math.tanh %29 : vector<16x16xf32>
    %cst_20 = arith.constant 1.000000e+00 : f32
    %31 = vector.broadcast %cst_20 : f32 to vector<16x16xf32>
    %32 = arith.addf %31, %30 : vector<16x16xf32>
    %cst_21 = arith.constant 5.000000e-01 : f32
    %33 = vector.broadcast %cst_21 : f32 to vector<16x16xf32>
    %34 = arith.mulf %33, %32 : vector<16x16xf32>
    %35 = arith.index_cast %16 : i32 to index
    %c0_22 = arith.constant 0 : index
    %36 = vector.load %arg11[%35, %c0_22] : memref<16x16xf32, #tpu.memory_space<vmem>>, vector<16x16xf32>
    tpu.vector_store %arg11[%35, %c0_22], %34 {strides = array<i32>} : memref<16x16xf32, #tpu.memory_space<vmem>>, vector<16x16xf32>,
    %cst_23 = arith.constant dense<0.000000e+00> : vector<16xf32>
    %37 = vector.multi_reduction <add>, %34, %cst_23 [1] : vector<16x16xf32> to vector<16xf32>
    %38 = vector.shape_cast %37 : vector<16xf32> to vector<16x1xf32>
    %39 = arith.index_cast %16 : i32 to index
    %c0_24 = arith.constant 0 : index
    %40 = vector.load %arg12[%39, %c0_24] : memref<16x1xf32, #tpu.memory_space<vmem>>, vector<16x1xf32>
    tpu.vector_store %arg12[%39, %c0_24], %38 {strides = array<i32>} : memref<16x1xf32, #tpu.memory_space<vmem>>, vector<16x1xf32>,
    %c1_i32 = arith.constant 1 : i32
    %c0_25 = arith.constant 0 : index
    %c0_26 = arith.constant 0 : index
    %41 = vector.load %arg12[%c0_25, %c0_26] : memref<16x1xf32, #tpu.memory_space<vmem>>, vector<16x1xf32>
    %cst_27 = arith.constant 0.000000e+00 : f32
    %42 = vector.broadcast %cst_27 : f32 to vector<16x1xf32>
    %43 = arith.cmpf ogt, %41, %42 : vector<16x1xf32>
    %44 = math.rsqrt %41 : vector<16x1xf32>
    %cst_28 = arith.constant 0.000000e+00 : f32
    %45 = vector.broadcast %cst_28 : f32 to vector<16x1xf32>
    %46 = arith.select %43, %44, %45 : vector<16x1xi1>, vector<16x1xf32>
    %c0_29 = arith.constant 0 : index
    %c0_30 = arith.constant 0 : index
    %47 = vector.load %arg11[%c0_29, %c0_30] : memref<16x16xf32, #tpu.memory_space<vmem>>, vector<16x16xf32>
    %48 = arith.truncf %47 : vector<16x16xf32> to vector<16x16xbf16>
    %c0_31 = arith.constant 0 : index
    %c0_32 = arith.constant 0 : index
    %49 = vector.load %arg6[%c0_31, %c0_32] : memref<128x128xbf16, #tpu.memory_space<vmem>>, vector<128x128xbf16>
    %50 = arith.truncf %12 : vector<16x128xf32> to vector<16x128xbf16>
    %cst_33 = arith.constant dense<0.000000e+00> : vector<16x128xf32>
    %51 = tpu.matmul %50, %49, %cst_33 {dimension_numbers = #tpu.dot_dimension_numbers<[1], [0], [0], [1], [0, 0, 1, 1], [], []>} : vector<16x128xbf16>, vector<128x128xbf16>, vector<16x128xf32> -> vector<16x128xf32>
    %c0_34 = arith.constant 0 : index
    %c0_35 = arith.constant 0 : index
    %52 = vector.load %arg7[%c0_34, %c0_35] : memref<128x128xbf16, #tpu.memory_space<vmem>>, vector<128x128xbf16>
    %cst_36 = arith.constant dense<0.000000e+00> : vector<16x128xf32>
    %53 = tpu.matmul %0, %52, %cst_36 {dimension_numbers = #tpu.dot_dimension_numbers<[1], [0], [0], [1], [0, 0, 1, 1], [], []>} : vector<16x128xbf16>, vector<128x128xbf16>, vector<16x128xf32> -> vector<16x128xf32>
    %54 = tpu.concatenate %51, %53 in 1 : vector<16x128xf32>, vector<16x128xf32> -> vector<16x256xf32>
    %55 = vector.broadcast %46 : vector<16x1xf32> to vector<16x256xf32>
    %56 = arith.mulf %55, %54 : vector<16x256xf32>
    %57 = arith.truncf %56 : vector<16x256xf32> to vector<16x256xbf16>
    %cst_37 = arith.constant dense<0.000000e+00> : vector<16x256xf32>
    %58 = tpu.matmul %48, %57, %cst_37 {dimension_numbers = #tpu.dot_dimension_numbers<[1], [0], [0], [1], [0, 0, 1, 1], [], []>} : vector<16x16xbf16>, vector<16x256xbf16>, vector<16x256xf32> -> vector<16x256xf32>
    %59 = vector.broadcast %46 : vector<16x1xf32> to vector<16x256xf32>
    %60 = arith.mulf %59, %58 : vector<16x256xf32>
    %61 = vector.extract_strided_slice %60 {offsets = [0, 0], sizes = [16, 128], strides = [1, 1]} : vector<16x256xf32> to vector<16x128xf32>
    %cst_38 = arith.constant 0.000000e+00 : f32
    %62 = vector.broadcast %cst_38 : f32 to vector<16x128xf32>
    %63 = arith.maximumf %61, %62 : vector<16x128xf32>
    %64 = vector.extract_strided_slice %60 {offsets = [0, 128], sizes = [16, 128], strides = [1, 1]} : vector<16x256xf32> to vector<16x128xf32>
    %cst_39 = arith.constant 0.000000e+00 : f32
    %65 = vector.broadcast %cst_39 : f32 to vector<16x128xf32>
    %66 = arith.maximumf %64, %65 : vector<16x128xf32>
    %67 = arith.addf %63, %66 : vector<16x128xf32>
    %c0_40 = arith.constant 0 : index
    %c0_41 = arith.constant 0 : index
    %68 = vector.load %arg8[%c0_40, %c0_41] : memref<128x128xbf16, #tpu.memory_space<vmem>>, vector<128x128xbf16>
    %69 = arith.truncf %67 : vector<16x128xf32> to vector<16x128xbf16>
    %cst_42 = arith.constant dense<0.000000e+00> : vector<16x128xf32>
    %70 = tpu.matmul %69, %68, %cst_42 {dimension_numbers = #tpu.dot_dimension_numbers<[1], [0], [0], [1], [0, 0, 1, 1], [], []>} : vector<16x128xbf16>, vector<128x128xbf16>, vector<16x128xf32> -> vector<16x128xf32>
    %71 = vector.broadcast %46 : vector<16x1xf32> to vector<16x128xf32>
    %72 = arith.mulf %71, %70 : vector<16x128xf32>
    %73 = arith.truncf %72 : vector<16x128xf32> to vector<16x128xbf16>
    %cst_43 = arith.constant dense<0.000000e+00> : vector<16x128xf32>
    %74 = tpu.matmul %48, %73, %cst_43 {dimension_numbers = #tpu.dot_dimension_numbers<[1], [0], [0], [1], [0, 0, 1, 1], [], []>} : vector<16x16xbf16>, vector<16x128xbf16>, vector<16x128xf32> -> vector<16x128xf32>
    %75 = vector.broadcast %46 : vector<16x1xf32> to vector<16x128xf32>
    %76 = arith.mulf %75, %74 : vector<16x128xf32>
    %cst_44 = arith.constant 5.000000e-01 : f32
    %77 = vector.broadcast %cst_44 : f32 to vector<16x128xf32>
    %78 = arith.mulf %77, %12 : vector<16x128xf32>
    %cst_45 = arith.constant 5.000000e-01 : f32
    %79 = vector.broadcast %cst_45 : f32 to vector<16x128xf32>
    %80 = arith.mulf %79, %76 : vector<16x128xf32>
    %81 = arith.addf %78, %80 : vector<16x128xf32>
    %c0_46 = arith.constant 0 : index
    %c0_47 = arith.constant 0 : index
    %82 = vector.load %arg5[%c0_46, %c0_47] : memref<128x128xbf16, #tpu.memory_space<vmem>>, vector<128x128xbf16>
    %83 = arith.truncf %81 : vector<16x128xf32> to vector<16x128xbf16>
    %cst_48 = arith.constant dense<0.000000e+00> : vector<16x128xf32>
    %84 = tpu.matmul %83, %82, %cst_48 {dimension_numbers = #tpu.dot_dimension_numbers<[1], [0], [0], [1], [0, 0, 1, 1], [], []>} : vector<16x128xbf16>, vector<128x128xbf16>, vector<16x128xf32> -> vector<16x128xf32>
    %85 = arith.truncf %84 : vector<16x128xf32> to vector<16x128xbf16>
    %cst_49 = arith.constant dense<0.000000e+00> : vector<16x128xf32>
    %86 = tpu.matmul %1, %85, %cst_49 {dimension_numbers = #tpu.dot_dimension_numbers<[1], [0], [0], [1], [0, 0, 1, 1], [], []>} : vector<16x16xbf16>, vector<16x128xbf16>, vector<16x128xf32> -> vector<16x128xf32>
    %87 = tpu.iota {dimensions = array<i32: 1>} : vector<16x128xi32>
    %c4_i32 = arith.constant 4 : i32
    %88 = vector.broadcast %c4_i32 : i32 to vector<16x128xi32>
    %89 = arith.cmpi slt, %87, %88 : vector<16x128xi32>
    %cst_50 = arith.constant -1.000000e+30 : f32
    %90 = vector.broadcast %cst_50 : f32 to vector<16x128xf32>
    %91 = arith.select %89, %86, %90 : vector<16x128xi1>, vector<16x128xf32>
    %cst_51 = arith.constant dense<0xFF800000> : vector<16xf32>
    %92 = vector.multi_reduction <maximumf>, %91, %cst_51 [1] : vector<16x128xf32> to vector<16xf32>
    %93 = vector.shape_cast %92 : vector<16xf32> to vector<16x1xf32>
    %94 = vector.broadcast %93 : vector<16x1xf32> to vector<16x128xf32>
    %95 = arith.subf %91, %94 : vector<16x128xf32>
    %96 = math.exp %95 : vector<16x128xf32>
    %cst_52 = arith.constant dense<0.000000e+00> : vector<16xf32>
    %97 = vector.multi_reduction <add>, %96, %cst_52 [1] : vector<16x128xf32> to vector<16xf32>
    %98 = vector.shape_cast %97 : vector<16xf32> to vector<16x1xf32>
    %99 = math.log %98 : vector<16x1xf32>
    %100 = vector.broadcast %99 : vector<16x1xf32> to vector<16x128xf32>
    %101 = arith.subf %95, %100 : vector<16x128xf32>
    %c0_53 = arith.constant 0 : index
    %c0_54 = arith.constant 0 : index
    %102 = vector.load %arg10[%c0_53, %c0_54] : memref<16x128xf32, #tpu.memory_space<vmem>>, vector<16x128xf32>
    tpu.vector_store %arg10[%c0_53, %c0_54], %101 {strides = array<i32>} : memref<16x128xf32, #tpu.memory_space<vmem>>, vector<16x128xf32>,
    return
  }
}

</mosaic_0001>

<bundles_post_ra>
// kernel: tpu_custom_call.1
= control target key start
LH: loop header
LB: loop body
LE: loop exit
PB: predicated region body
PF: predicated region fallthrough
CT: control target
= control target key end

     0   :  { %16 = vsyncpa [#allocation5], 0  ;;  %s2217_s0 = inlined_call_operand.hbm [shape: bf16[16,128], index: 0, kind: input, shape index: {}]   ;;  %s2218_s1 = inlined_call_operand.hbm [shape: bf16[16,16], index: 1, kind: input, shape index: {}]   ;;  %s2219_s2 = inlined_call_operand.hbm [shape: f32[16,16], index: 2, kind: input, shape index: {}]   ;;  %s2220_s3 = inlined_call_operand.hbm [shape: bf16[128,128], index: 3, kind: input, shape index: {}]   ;;  %s2221_s4 = inlined_call_operand.hbm [shape: bf16[128,128], index: 4, kind: input, shape index: {}]   ;;  %s2222_s5 = inlined_call_operand.hbm [shape: bf16[128,128], index: 5, kind: input, shape index: {}]   ;;  %s2223_s6 = inlined_call_operand.hbm [shape: bf16[128,128], index: 6, kind: input, shape index: {}]   ;;  %s2224_s7 = inlined_call_operand.hbm [shape: bf16[128,128], index: 7, kind: input, shape index: {}]   ;;  %s2225_s8 = inlined_call_operand.hbm [shape: bf16[128,128], index: 8, kind: input, shape index: {}]   ;;  %s2226_s9 = inlined_call_operand.hbm [shape: f32[16,16], index: 9, kind: output, shape index: {0}]   ;;  %s2227_s10 = inlined_call_operand.hbm [shape: f32[16,128], index: 10, kind: output, shape index: {1}]  }
   0x1   :  { %17 = vsyncpa [#allocation8], 0 }
   0x2   :  { %18 = vsyncpa [#allocation11], 0 }
   0x3   :  { %19 = vsyncpa [#allocation14], 0 }
   0x4   :  { %20 = vsyncpa [#allocation17], 0 }
   0x5   :  { %21 = vsyncpa [#allocation6], 0 }
   0x6   :  { %22 = vsyncpa [#allocation21], 0  ;;  %s1826_s13 = smov [#allocation7]   ;;  %s1827_s15 = smov [#allocation10]  }
   0x7   :  { %s40_s14 = sshll.u32 %s1826_s13, 4  ;;  %s64_s16 = sshll.u32 %s1827_s15, 4  ;;  %s41_s14 = int_to_ptr.vmem [resolvable:$true] %s40_s14  ;;  %s1899_s16 = int_to_ptr.vmem [resolvable:$true] %s64_s16 }
   0x8   :  { %s1570_s19 = scalar_lea.hbm %s2218_s1, 128 }
   0x9   :  { %p1571_p0 = scmp.ne.s32.totalorder %s2218_s1, %s1570_s19  ;;  %p1574_p1 = scmp.lt.u32.totalorder %s1570_s19, %s2218_s1 }
   0xb   :  { %p1576_p2 = pnand %p1574_p1, %p1571_p0 }
   0xd   :  { %1579 = shalt.err (!%p1576_p2)
}
   0xe   :  { %s1580_s24 = scalar_lea.vmem %s41_s14, 128  ;;  %p1585_p4 = scmp.lt.s32.totalorder %s41_s14, %s41_s14 }
   0xf   :  { %p1581_p3 = scmp.ne.s32.totalorder %s41_s14, %s1580_s24  ;;  %p1586_p5 = scmp.lt.s32.totalorder %s1580_s24, %s1580_s24 }
  0x11   :  { %p1587_p6 = por %p1586_p5, %p1585_p4 }
  0x13   :  { %p1588_p7 = pnand %p1587_p6, %p1581_p3 }
  0x15   :  { %1591 = shalt.err (!%p1588_p7)
}
  0x16   :  { %s1828_s25 = smov 64   ;;  %s1829_s26 = smov 4  }
  0x17   :  { %46 = dma.hbm_to_vmem [thread:$0]  %s2218_s1, 128, %s41_s14, [#allocation8], %s1828_s25, %s1828_s25, %s1829_s26  }
  0x18   :  { %s1592_s11 = scalar_lea.hbm %s2220_s3, 1024 }
  0x19   :  { %p1593_p8 = scmp.ne.s32.totalorder %s2220_s3, %s1592_s11  ;;  %p1596_p9 = scmp.lt.u32.totalorder %s1592_s11, %s2220_s3 }
  0x1b   :  { %p1598_p10 = pnand %p1596_p9, %p1593_p8 }
  0x1d   :  { %1601 = shalt.err (!%p1598_p10)
}
  0x1e   :  { %s1602_s18 = scalar_lea.vmem %s1899_s16, 1024  ;;  %p1607_p12 = scmp.lt.s32.totalorder %s1899_s16, %s1899_s16 }
  0x1f   :  { %p1603_p11 = scmp.ne.s32.totalorder %s1899_s16, %s1602_s18  ;;  %p1608_p13 = scmp.lt.s32.totalorder %s1602_s18, %s1602_s18 }
  0x21   :  { %p1609_p0 = por %p1608_p13, %p1607_p12 }
  0x23   :  { %p1610_p1 = pnand %p1609_p0, %p1603_p11 }
  0x25   :  { %1613 = shalt.err (!%p1610_p1)
}
  0x26   :  { %70 = dma.hbm_to_vmem [thread:$0]  %s2220_s3, 1024, %s1899_s16, [#allocation11], %s1828_s25, %s1828_s25, %s1829_s26  }
  0x27   :  { %s1830_s19 = smov [#allocation13]   ;;  %s1831_s21 = smov [#allocation16]  }
  0x28   :  { %s88_s20 = sshll.u32 %s1830_s19, 4  ;;  %s112_s22 = sshll.u32 %s1831_s21, 4  ;;  %s89_s20 = int_to_ptr.vmem [resolvable:$true] %s88_s20  ;;  %s1936_s22 = int_to_ptr.vmem [resolvable:$true] %s112_s22 }
  0x29   :  { %s1614_s27 = scalar_lea.hbm %s2222_s5, 1024 }
  0x2a   :  { %p1615_p2 = scmp.ne.s32.totalorder %s2222_s5, %s1614_s27  ;;  %p1618_p3 = scmp.lt.u32.totalorder %s1614_s27, %s2222_s5 }
  0x2c   :  { %p1620_p4 = pnand %p1618_p3, %p1615_p2 }
  0x2e   :  { %1623 = shalt.err (!%p1620_p4)
}
  0x2f   :  { %s1624_s3 = scalar_lea.vmem %s89_s20, 1024  ;;  %p1629_p6 = scmp.lt.s32.totalorder %s89_s20, %s89_s20 }
  0x30   :  { %p1625_p5 = scmp.ne.s32.totalorder %s89_s20, %s1624_s3  ;;  %p1630_p7 = scmp.lt.s32.totalorder %s1624_s3, %s1624_s3 }
  0x32   :  { %p1631_p8 = por %p1630_p7, %p1629_p6 }
  0x34   :  { %p1632_p9 = pnand %p1631_p8, %p1625_p5 }
  0x36   :  { %1635 = shalt.err (!%p1632_p9)
}
  0x37   :  { %94 = dma.hbm_to_vmem [thread:$0]  %s2222_s5, 1024, %s89_s20, [#allocation14], %s1828_s25, %s1828_s25, %s1829_s26  }
  0x38   :  { %s1636_s17 = scalar_lea.hbm %s2224_s7, 1024 }
  0x39   :  { %p1637_p10 = scmp.ne.s32.totalorder %s2224_s7, %s1636_s17  ;;  %p1640_p11 = scmp.lt.u32.totalorder %s1636_s17, %s2224_s7 }
  0x3b   :  { %p1642_p12 = pnand %p1640_p11, %p1637_p10 }
  0x3d   :  { %1645 = shalt.err (!%p1642_p12)
}
  0x3e   :  { %s1646_s21 = scalar_lea.vmem %s1936_s22, 1024  ;;  %p1651_p0 = scmp.lt.s32.totalorder %s1936_s22, %s1936_s22 }
  0x3f   :  { %p1647_p13 = scmp.ne.s32.totalorder %s1936_s22, %s1646_s21  ;;  %p1652_p1 = scmp.lt.s32.totalorder %s1646_s21, %s1646_s21 }
  0x41   :  { %p1653_p2 = por %p1652_p1, %p1651_p0 }
  0x43   :  { %p1654_p3 = pnand %p1653_p2, %p1647_p13 }
  0x45   :  { %1657 = shalt.err (!%p1654_p3)
}
  0x46   :  { %118 = dma.hbm_to_vmem [thread:$0]  %s2224_s7, 1024, %s1936_s22, [#allocation17], %s1828_s25, %s1828_s25, %s1829_s26  }
  0x47   :  { %s1832_s23 = smov [#allocation4]   ;;  %s1833_s27 = smov [#allocation9]  }
  0x48   :  { %s28_s24 = sshll.u32 %s1832_s23, 4  ;;  %s52_s28 = sshll.u32 %s1833_s27, 4  ;;  %s29_s24 = int_to_ptr.vmem [resolvable:$true] %s28_s24  ;;  %s1973_s28 = int_to_ptr.vmem [resolvable:$true] %s52_s28 }
  0x49   :  { %s1658_s11 = scalar_lea.hbm %s2217_s0, 128 }
  0x4a   :  { %p1659_p4 = scmp.ne.s32.totalorder %s2217_s0, %s1658_s11  ;;  %p1662_p5 = scmp.lt.u32.totalorder %s1658_s11, %s2217_s0 }
  0x4c   :  { %p1664_p6 = pnand %p1662_p5, %p1659_p4 }
  0x4e   :  { %1667 = shalt.err (!%p1664_p6)
}
  0x4f   :  { %s1668_s7 = scalar_lea.vmem %s29_s24, 128  ;;  %p1673_p8 = scmp.lt.s32.totalorder %s29_s24, %s29_s24 }
  0x50   :  { %p1669_p7 = scmp.ne.s32.totalorder %s29_s24, %s1668_s7  ;;  %p1674_p9 = scmp.lt.s32.totalorder %s1668_s7, %s1668_s7 }
  0x52   :  { %p1675_p10 = por %p1674_p9, %p1673_p8 }
  0x54   :  { %p1676_p11 = pnand %p1675_p10, %p1669_p7 }
  0x56   :  { %1679 = shalt.err (!%p1676_p11)
}
  0x57   :  { %34 = dma.hbm_to_vmem [thread:$0]  %s2217_s0, 128, %s29_s24, [#allocation5], %s1828_s25, %s1828_s25, %s1829_s26  }
  0x58   :  { %s1680_s1 = scalar_lea.hbm %s2219_s2, 256 }
  0x59   :  { %p1681_p12 = scmp.ne.s32.totalorder %s2219_s2, %s1680_s1  ;;  %p1684_p13 = scmp.lt.u32.totalorder %s1680_s1, %s2219_s2 }
  0x5b   :  { %p1686_p0 = pnand %p1684_p13, %p1681_p12 }
  0x5d   :  { %1689 = shalt.err (!%p1686_p0)
}
  0x5e   :  { %s1690_s20 = scalar_lea.vmem %s1973_s28, 256  ;;  %p1695_p2 = scmp.lt.s32.totalorder %s1973_s28, %s1973_s28 }
  0x5f   :  { %p1691_p1 = scmp.ne.s32.totalorder %s1973_s28, %s1690_s20  ;;  %p1696_p3 = scmp.lt.s32.totalorder %s1690_s20, %s1690_s20 }
  0x61   :  { %p1697_p4 = por %p1696_p3, %p1695_p2 }
  0x63   :  { %p1698_p5 = pnand %p1697_p4, %p1691_p1 }
  0x65   :  { %1701 = shalt.err (!%p1698_p5)
}
  0x66   :  { %s1834_s0 = smov 128   ;;  %s1835_s23 = smov 8  }
  0x67   :  { %58 = dma.hbm_to_vmem [thread:$0]  %s2219_s2, 256, %s1973_s28, [#allocation8], %s1834_s0, %s1834_s0, %s1835_s23  }
  0x68   :  { %s1836_s29 = smov [#allocation12]   ;;  %s1837_s11 = smov [#allocation15]  }
  0x69   :  { %s76_s30 = sshll.u32 %s1836_s29, 4  ;;  %s100_s3 = sshll.u32 %s1837_s11, 4  ;;  %s77_s30 = int_to_ptr.vmem [resolvable:$true] %s76_s30  ;;  %s2010_s3 = int_to_ptr.vmem [resolvable:$true] %s100_s3 }
  0x6a   :  { %s1702_s13 = scalar_lea.hbm %s2221_s4, 1024 }
  0x6b   :  { %p1703_p6 = scmp.ne.s32.totalorder %s2221_s4, %s1702_s13  ;;  %p1706_p7 = scmp.lt.u32.totalorder %s1702_s13, %s2221_s4 }
  0x6d   :  { %p1708_p8 = pnand %p1706_p7, %p1703_p6 }
  0x6f   :  { %1711 = shalt.err (!%p1708_p8)
}
  0x70   :  { %s1712_s2 = scalar_lea.vmem %s77_s30, 1024  ;;  %p1717_p10 = scmp.lt.s32.totalorder %s77_s30, %s77_s30 }
  0x71   :  { %p1713_p9 = scmp.ne.s32.totalorder %s77_s30, %s1712_s2  ;;  %p1718_p11 = scmp.lt.s32.totalorder %s1712_s2, %s1712_s2 }
  0x73   :  { %p1719_p12 = por %p1718_p11, %p1717_p10 }
  0x75   :  { %p1720_p13 = pnand %p1719_p12, %p1713_p9 }
  0x77   :  { %1723 = shalt.err (!%p1720_p13)
}
  0x78   :  { %82 = dma.hbm_to_vmem [thread:$0]  %s2221_s4, 1024, %s77_s30, [#allocation11], %s1828_s25, %s1828_s25, %s1829_s26  }
  0x79   :  { %s1724_s19 = scalar_lea.hbm %s2223_s6, 1024 }
  0x7a   :  { %p1725_p0 = scmp.ne.s32.totalorder %s2223_s6, %s1724_s19  ;;  %p1728_p1 = scmp.lt.u32.totalorder %s1724_s19, %s2223_s6 }
  0x7c   :  { %p1730_p2 = pnand %p1728_p1, %p1725_p0 }
  0x7e   :  { %1733 = shalt.err (!%p1730_p2)
}
  0x7f   :  { %s1734_s27 = scalar_lea.vmem %s2010_s3, 1024  ;;  %p1739_p4 = scmp.lt.s32.totalorder %s2010_s3, %s2010_s3 }
  0x80   :  { %p1735_p3 = scmp.ne.s32.totalorder %s2010_s3, %s1734_s27  ;;  %p1740_p5 = scmp.lt.s32.totalorder %s1734_s27, %s1734_s27 }
  0x82   :  { %p1741_p6 = por %p1740_p5, %p1739_p4 }
  0x84   :  { %p1742_p7 = pnand %p1741_p6, %p1735_p3 }
  0x86   :  { %1745 = shalt.err (!%p1742_p7)
}
  0x87   :  { %106 = dma.hbm_to_vmem [thread:$0]  %s2223_s6, 1024, %s2010_s3, [#allocation14], %s1828_s25, %s1828_s25, %s1829_s26  }
  0x88   :  { %s1838_s30 = smov [#allocation18]   ;;  %s1746_s13 = scalar_lea.hbm %s2225_s8, 1024 }
  0x89   :  { %s124_s11 = sshll.u32 %s1838_s30, 4  ;;  %p1747_p8 = scmp.ne.s32.totalorder %s2225_s8, %s1746_s13  ;;  %s125_s11 = int_to_ptr.vmem [resolvable:$true] %s124_s11 }
  0x8a   :  { %p1750_p9 = scmp.lt.u32.totalorder %s1746_s13, %s2225_s8 }
  0x8c   :  { %p1752_p10 = pnand %p1750_p9, %p1747_p8 }
  0x8e   :  { %1755 = shalt.err (!%p1752_p10)
}
  0x8f   :  { %s1756_s2 = scalar_lea.vmem %s125_s11, 1024  ;;  %p1761_p12 = scmp.lt.s32.totalorder %s125_s11, %s125_s11 }
  0x90   :  { %p1757_p11 = scmp.ne.s32.totalorder %s125_s11, %s1756_s2  ;;  %p1762_p13 = scmp.lt.s32.totalorder %s1756_s2, %s1756_s2 }
  0x92   :  { %p1763_p0 = por %p1762_p13, %p1761_p12 }
  0x94   :  { %p1764_p1 = pnand %p1763_p0, %p1757_p11 }
  0x96   :  { %1767 = shalt.err (!%p1764_p1)
}
  0x97   :  { %130 = dma.hbm_to_vmem [thread:$0]  %s2225_s8, 1024, %s125_s11, [#allocation17], %s1828_s25, %s1828_s25, %s1829_s26  }
  0x98   :  { %1812 = dma.done.wait [#allocation5], 128  }
  0x99   :  { %1813 = vsyncadd [#allocation5], 4294967168 }
  0x9a   :  { %1814 = dma.done.wait [#allocation8], 384  }
  0x9b   :  { %1815 = vsyncadd [#allocation8], 4294966912 }
  0x9c   :  { %1816 = dma.done.wait [#allocation11], 2048  }
  0x9d   :  { %1817 = vsyncadd [#allocation11], 4294965248 }
  0x9e   :  { %1818 = dma.done.wait [#allocation14], 2048  }
  0x9f   :  { %1819 = vsyncadd [#allocation14], 4294965248 }
  0xa0   :  { %1820 = dma.done.wait [#allocation17], 2048  }
  0xa1   :  { %1821 = vsyncadd [#allocation17], 4294965248  ;;  %v1839_v0 = vmov 0.0   ;;  %vm1840_vm0 = vmmov 0   ;;  %v1504_v1 = vld [vmem:[#allocation10] sm:$0xff]   ;;  %v1505_v2 = vld [vmem:[#allocation10 + $0x8] sm:$0xff]  }
  0xa2   :  { %1334 = vmatprep.subr.bf16.mxu0 %v1839_v0  ;;  %1350 = vmatprep.mubr.msk.bf16.mxu0 %vm1840_vm0, %v1839_v0  ;;  %v1506_v3 = vld [vmem:[#allocation10 + $0x10] sm:$0xff]   ;;  %v1507_v4 = vld [vmem:[#allocation10 + $0x18] sm:$0xff]   ;;  %v1508_v5 = vld [vmem:[#allocation10 + $0x20] sm:$0xff]   ;;  %vm280_vm1 = vcmask 130048   ;;  %vm547_vm2 = vcmask 7168   ;;  %s1842_s8 = smov [#allocation19]  }
  0xa3   :  { %1354 = vmatprep.subr.bf16.mxu1 %v1839_v0  ;;  %1356 = vmatprep.mubr.msk.bf16.mxu1 %vm1840_vm0, %v1839_v0  ;;  %v1509_v6 = vld [vmem:[#allocation10 + $0x28] sm:$0xff]   ;;  %v1510_v7 = vld [vmem:[#allocation10 + $0x30] sm:$0xff]   ;;  %v1511_v8 = vld [vmem:[#allocation10 + $0x38] sm:$0xff]   ;;  %s1181_s25 = sshll.u32 %s1842_s8, 4  ;;  %s1182_s25 = int_to_ptr.vmem [resolvable:$true] %s1181_s25 }
  0xa4   :  { %1335 = vmatpush3.bf16.msra.mxu0 %v1504_v1  ;;  %v2075_v9 = vld [vmem:[#allocation4] sm:$0xff]   ;;  %v2081_v15 = vld [vmem:[#allocation7] sm:$0xff]   ;;  %v1516_v18 = vld [vmem:[#allocation12 + $0x10] sm:$0xff]   ;;  %s1768_s26 = scalar_lea.vmem %s1182_s25, 256  ;;  %p1773_p3 = scmp.lt.s32.totalorder %s1182_s25, %s1182_s25 }
  0xa5   :  { %1336 = vmatprep.subr.bf16.mxu0 %v1839_v0  ;;  %v1514_v16 = vld [vmem:[#allocation12] sm:$0xff]   ;;  %v1515_v17 = vld [vmem:[#allocation12 + $0x8] sm:$0xff]   ;;  %v1517_v19 = vld [vmem:[#allocation12 + $0x18] sm:$0xff]   ;;  %p1769_p2 = scmp.ne.s32.totalorder %s1182_s25, %s1768_s26  ;;  %p1774_p4 = scmp.lt.s32.totalorder %s1768_s26, %s1768_s26 }
  0xa6   :  { %v1518_v20 = vld [vmem:[#allocation12 + $0x20] sm:$0xff]   ;;  %v1519_v21 = vld [vmem:[#allocation12 + $0x28] sm:$0xff]   ;;  %v1520_v22 = vld [vmem:[#allocation12 + $0x30] sm:$0xff]  }
  0xa7   :  { %v1521_v23 = vld [vmem:[#allocation12 + $0x38] sm:$0xff]   ;;  %v1522_v36 = vld [vmem:[#allocation15] sm:$0xff]   ;;  %v1523_v37 = vld [vmem:[#allocation15 + $0x8] sm:$0xff]   ;;  %p1775_p5 = por %p1774_p4, %p1773_p3 }
  0xa8   :  { %1337 = vmatpush3.bf16.msra.mxu0 %v1505_v2  ;;  %v1524_v38 = vld [vmem:[#allocation15 + $0x10] sm:$0xff]   ;;  %v1525_v39 = vld [vmem:[#allocation15 + $0x18] sm:$0xff]   ;;  %v1526_v40 = vld [vmem:[#allocation15 + $0x20] sm:$0xff]  }
  0xa9   :  { %1338 = vmatprep.subr.bf16.mxu0 %v1839_v0  ;;  %v1527_v41 = vld [vmem:[#allocation15 + $0x28] sm:$0xff]   ;;  %v1528_v42 = vld [vmem:[#allocation15 + $0x30] sm:$0xff]   ;;  %v1529_v43 = vld [vmem:[#allocation15 + $0x38] sm:$0xff]   ;;  %p1776_p6 = pnand %p1775_p5, %p1769_p2 }
  0xaa   :  { %v1530_v49 = vld [vmem:[#allocation16] sm:$0xff]   ;;  %v1531_v50 = vld [vmem:[#allocation16 + $0x8] sm:$0xff]   ;;  %v1532_v51 = vld [vmem:[#allocation16 + $0x10] sm:$0xff]  }
  0xab   :  { %v1533_v52 = vld [vmem:[#allocation16 + $0x18] sm:$0xff]   ;;  %v1534_v53 = vld [vmem:[#allocation16 + $0x20] sm:$0xff]   ;;  %v1535_v54 = vld [vmem:[#allocation16 + $0x28] sm:$0xff]  }
  0xac   :  { %1339 = vmatpush3.bf16.msra.mxu0 %v1506_v3  ;;  %v1536_v55 = vld [vmem:[#allocation16 + $0x30] sm:$0xff]   ;;  %v1537_v56 = vld [vmem:[#allocation16 + $0x38] sm:$0xff]  }
  0xad   :  { %1340 = vmatprep.subr.bf16.mxu0 %v1839_v0  ;;  %v525_v3 = vld [vmem:[#allocation9] sm:$0xff] }
  0xb0   :  { %1341 = vmatpush3.bf16.msra.mxu0 %v1507_v4 }
  0xb1   :  { %1342 = vmatprep.subr.bf16.mxu0 %v1839_v0 }
  0xb4   :  { %1343 = vmatpush3.bf16.msra.mxu0 %v1508_v5 }
  0xb5   :  { %1344 = vmatprep.subr.bf16.mxu0 %v1839_v0 }
  0xb8   :  { %1345 = vmatpush3.bf16.msra.mxu0 %v1509_v6  ;;  %v526_v6 = vld [vmem:[#allocation9 + $0x8] sm:$0xff] }
  0xb9   :  { %1346 = vmatprep.subr.bf16.mxu0 %v1839_v0 }
  0xbc   :  { %1347 = vmatpush3.bf16.msra.mxu0 %v1510_v7 }
  0xbd   :  { %1348 = vmatprep.subr.bf16.mxu0 %v1839_v0 }
  0xc0   :  { %1349 = vmatpush3.bf16.msra.mxu0 %v1511_v8 }
  0xc1   :  { %1380 = vmatprep.subr.bf16.mxu0 %v1839_v0 }
  0xc3   :  { %1351 = vmatmul.mubr.bf16.vlgmr.msra.gmra.mrb[0].mxu0 %v2075_v9 }
  0xc4   :  { %1382 = vmatprep.mubr.msk.bf16.mxu0 %vm1840_vm0, %v1839_v0 }
 0x196   :  { %v267_v10 = vpop.f32.mrb[0].mxu0 }
 0x197   :  { %v1352_v11 = vpop.f32.mrb[1].mxu0 }
 0x198   :  { %v270_v12 = vpop.f32.mrb[2].mxu0 }
 0x199   :  { %v274_v13 = vpack.c.bf16 %v270_v12, %v267_v10  ;;  %v1353_v14 = vpop.f32.mrb[3].mxu0 }
 0x19b   :  { %1355 = vmatpush3.bf16.msra.mxu1 %v274_v13 }
 0x19c   :  { %1360 = vmatprep.subr.bf16.mxu1 %v1839_v0 }
 0x19e   :  { %1357 = vmatmul.mubr.msk.bf16.vlgmr.msra.gmra.mrb[0].mxu1 %vm280_vm1, %v2081_v15 }
 0x19f   :  { %1361 = vmatpush3.bf16.msra.mxu1 %v1514_v16  ;;  %1376 = vmatprep.mubr.msk.bf16.mxu1 %vm1840_vm0, %v1839_v0 }
 0x1a0   :  { %1362 = vmatprep.subr.bf16.mxu1 %v1839_v0 }
 0x1a3   :  { %1363 = vmatpush3.bf16.msra.mxu1 %v1515_v17 }
 0x1a4   :  { %1364 = vmatprep.subr.bf16.mxu1 %v1839_v0 }
 0x1a7   :  { %1365 = vmatpush3.bf16.msra.mxu1 %v1516_v18 }
 0x1a8   :  { %1366 = vmatprep.subr.bf16.mxu1 %v1839_v0 }
 0x1ab   :  { %1367 = vmatpush3.bf16.msra.mxu1 %v1517_v19 }
 0x1ac   :  { %1368 = vmatprep.subr.bf16.mxu1 %v1839_v0 }
 0x1af   :  { %1369 = vmatpush3.bf16.msra.mxu1 %v1518_v20 }
 0x1b0   :  { %1370 = vmatprep.subr.bf16.mxu1 %v1839_v0 }
 0x1b3   :  { %1371 = vmatpush3.bf16.msra.mxu1 %v1519_v21 }
 0x1b4   :  { %1372 = vmatprep.subr.bf16.mxu1 %v1839_v0 }
 0x1b7   :  { %1373 = vmatpush3.bf16.msra.mxu1 %v1520_v22 }
 0x1b8   :  { %1374 = vmatprep.subr.bf16.mxu1 %v1839_v0 }
 0x1bb   :  { %1375 = vmatpush3.bf16.msra.mxu1 %v1521_v23  ;;  %v1841_v23 = vmov 0  }
 0x1bc   :  { %1386 = vmatprep.subr.bf16.mxu1 %v1839_v0  ;;  %1502 = vset.pattern.permute.xlu1 %v1841_v23 }
 0x1bd   :  { %1503 = vset.pattern.permute.xlu0 %v1841_v23 }
 0x271   :  { %v318_v24 = vpop.f32.mrb[0].mxu1 }
 0x272   :  { %v1358_v25 = vpop.f32.mrb[1].mxu1  ;;  %v325_v27 = vmax.f32 %v318_v24, 0.0 }
 0x273   :  { %v321_v26 = vpop.f32.mrb[2].mxu1 }
 0x274   :  { %v326_v28 = vmax.f32 %v321_v26, 0.0  ;;  %v1359_v29 = vpop.f32.mrb[3].mxu1 }
 0x276   :  { %v343_v30 = vpack.c.bf16 %v326_v28, %v325_v27 }
 0x278   :  { %1377 = vmatmul.mubr.bf16.vlgmr.msra.gmra.mrb[4].mxu1 %v343_v30 }
 0x279   :  { %1388 = vmatprep.mubr.msk.bf16.mxu1 %vm1840_vm0, %v1839_v0 }
 0x34b   :  { %v426_v31 = vpop.f32.mrb[4].mxu1 }
 0x34c   :  { %v1378_v32 = vpop.f32.mrb[5].mxu1 }
 0x34d   :  { %v429_v33 = vpop.f32.mrb[6].mxu1 }
 0x34e   :  { %v433_v34 = vpack.c.bf16 %v429_v33, %v426_v31  ;;  %v1379_v35 = vpop.f32.mrb[7].mxu1 }
 0x350   :  { %1381 = vmatpush3.bf16.msra.mxu0 %v433_v34 }
 0x351   :  { %1392 = vmatprep.subr.bf16.mxu0 %v1839_v0 }
 0x353   :  { %1383 = vmatmul.mubr.msk.bf16.vlgmr.msra.gmra.mrb[4].mxu0 %vm280_vm1, %v2081_v15 }
 0x354   :  { %1393 = vmatpush3.bf16.msra.mxu0 %v1522_v36  ;;  %1408 = vmatprep.mubr.msk.bf16.mxu0 %vm1840_vm0, %v1839_v0  ;;  %v1538_v36 = vld [vmem:[#allocation18] sm:$0xff]  }
 0x355   :  { %1394 = vmatprep.subr.bf16.mxu0 %v1839_v0 }
 0x358   :  { %1395 = vmatpush3.bf16.msra.mxu0 %v1523_v37  ;;  %v1539_v37 = vld [vmem:[#allocation18 + $0x8] sm:$0xff]  }
 0x359   :  { %1396 = vmatprep.subr.bf16.mxu0 %v1839_v0 }
 0x35c   :  { %1397 = vmatpush3.bf16.msra.mxu0 %v1524_v38  ;;  %v1540_v38 = vld [vmem:[#allocation18 + $0x10] sm:$0xff]  }
 0x35d   :  { %1398 = vmatprep.subr.bf16.mxu0 %v1839_v0 }
 0x360   :  { %1399 = vmatpush3.bf16.msra.mxu0 %v1525_v39  ;;  %v1541_v39 = vld [vmem:[#allocation18 + $0x18] sm:$0xff]  }
 0x361   :  { %1400 = vmatprep.subr.bf16.mxu0 %v1839_v0 }
 0x364   :  { %1401 = vmatpush3.bf16.msra.mxu0 %v1526_v40  ;;  %v1542_v40 = vld [vmem:[#allocation18 + $0x20] sm:$0xff]  }
 0x365   :  { %1402 = vmatprep.subr.bf16.mxu0 %v1839_v0 }
 0x368   :  { %1403 = vmatpush3.bf16.msra.mxu0 %v1527_v41 }
 0x369   :  { %1404 = vmatprep.subr.bf16.mxu0 %v1839_v0 }
 0x36c   :  { %1405 = vmatpush3.bf16.msra.mxu0 %v1528_v42 }
 0x36d   :  { %1406 = vmatprep.subr.bf16.mxu0 %v1839_v0 }
 0x370   :  { %1407 = vmatpush3.bf16.msra.mxu0 %v1529_v43 }
 0x426   :  { %v2110_v44 = vpop.f32.mrb[4].mxu0 }
 0x427   :  { %v1384_v45 = vpop.f32.mrb[5].mxu0 }
 0x428   :  { %v2112_v46 = vpop.f32.mrb[6].mxu0 }
 0x429   :  { %v475_v47 = vpack.c.bf16 %v2112_v46, %v2110_v44  ;;  %v1385_v48 = vpop.f32.mrb[7].mxu0 }
 0x42b   :  { %1387 = vmatpush3.bf16.xpose.msra.mxu1 %v475_v47  ;;  %1409 = vmatmul.mubr.bf16.vlgmr.msra.gmra.mrb[8].mxu0 %v475_v47 }
 0x42c   :  { %1412 = vmatprep.subr.bf16.mxu1 %v1839_v0  ;;  %822 = vmatprep.mubr.bf16.mxu0 %v1841_v23  ;;  %v1552_v23 = vld [vmem:[#allocation13 + $0x30] sm:$0xff]  }
 0x432   :  { %1389 = vmatmul.mubr.bf16.vlgmr.msra.gmra.mrb[8].mxu1 %v475_v47 }
 0x433   :  { %1428 = vmatprep.mubr.msk.bf16.mxu1 %vm1840_vm0, %v1839_v0  ;;  %1413 = vmatpush3.bf16.msra.mxu1 %v1530_v49 }
 0x434   :  { %1414 = vmatprep.subr.bf16.mxu1 %v1839_v0 }
 0x437   :  { %1415 = vmatpush3.bf16.msra.mxu1 %v1531_v50 }
 0x438   :  { %1416 = vmatprep.subr.bf16.mxu1 %v1839_v0 }
 0x43b   :  { %1417 = vmatpush3.bf16.msra.mxu1 %v1532_v51 }
 0x43c   :  { %1418 = vmatprep.subr.bf16.mxu1 %v1839_v0 }
 0x43f   :  { %1419 = vmatpush3.bf16.msra.mxu1 %v1533_v52 }
 0x440   :  { %1420 = vmatprep.subr.bf16.mxu1 %v1839_v0 }
 0x443   :  { %1421 = vmatpush3.bf16.msra.mxu1 %v1534_v53 }
 0x444   :  { %1422 = vmatprep.subr.bf16.mxu1 %v1839_v0 }
 0x447   :  { %1423 = vmatpush3.bf16.msra.mxu1 %v1535_v54  ;;  %v1543_v54 = vld [vmem:[#allocation18 + $0x28] sm:$0xff]  }
 0x448   :  { %1424 = vmatprep.subr.bf16.mxu1 %v1839_v0 }
 0x44b   :  { %1425 = vmatpush3.bf16.msra.mxu1 %v1536_v55  ;;  %v1544_v55 = vld [vmem:[#allocation18 + $0x30] sm:$0xff]  }
 0x44c   :  { %1426 = vmatprep.subr.bf16.mxu1 %v1839_v0 }
 0x44f   :  { %1427 = vmatpush3.bf16.msra.mxu1 %v1537_v56  ;;  %v1545_v56 = vld [vmem:[#allocation18 + $0x38] sm:$0xff]  }
 0x450   :  { %1432 = vmatprep.subr.bf16.mxu1 %v1839_v0 }
 0x452   :  { %1429 = vmatmul.mubr.bf16.vlgmr.msra.gmra.mrb[12].mxu1 %v2075_v9 }
 0x453   :  { %1448 = vmatprep.mubr.msk.bf16.mxu1 %vm1840_vm0, %v1839_v0  ;;  %1433 = vmatpush3.bf16.msra.mxu1 %v1538_v36 }
 0x454   :  { %1434 = vmatprep.subr.bf16.mxu1 %v1839_v0 }
 0x457   :  { %1435 = vmatpush3.bf16.msra.mxu1 %v1539_v37 }
 0x458   :  { %1436 = vmatprep.subr.bf16.mxu1 %v1839_v0 }
 0x45b   :  { %1437 = vmatpush3.bf16.msra.mxu1 %v1540_v38 }
 0x45c   :  { %1438 = vmatprep.subr.bf16.mxu1 %v1839_v0 }
 0x45f   :  { %1439 = vmatpush3.bf16.msra.mxu1 %v1541_v39 }
 0x460   :  { %1440 = vmatprep.subr.bf16.mxu1 %v1839_v0 }
 0x463   :  { %1441 = vmatpush3.bf16.msra.mxu1 %v1542_v40 }
 0x464   :  { %1442 = vmatprep.subr.bf16.mxu1 %v1839_v0 }
 0x467   :  { %1443 = vmatpush3.bf16.msra.mxu1 %v1543_v54 }
 0x468   :  { %1444 = vmatprep.subr.bf16.mxu1 %v1839_v0 }
 0x46b   :  { %1445 = vmatpush3.bf16.msra.mxu1 %v1544_v55 }
 0x46c   :  { %1446 = vmatprep.subr.bf16.mxu1 %v1839_v0 }
 0x46f   :  { %1447 = vmatpush3.bf16.msra.mxu1 %v1545_v56 }
 0x470   :  { %1478 = vmatprep.subr.bf16.mxu1 %v1839_v0 }
 0x4fe   :  { %v2130_v57 = vpop.f32.mrb[8].mxu0 }
 0x4ff   :  { %v1410_v58 = vpop.f32.mrb[9].mxu0 }
 0x500   :  { %v2132_v59 = vpop.f32.mrb[10].mxu0 }
 0x501   :  { %v1411_v60 = vpop.f32.mrb[11].mxu0 }
 0x505   :  { %v510_v61 = vpop.f32.mrb[8].mxu1 }
 0x506   :  { %517 = vst.msk [vmem:[#allocation19] sm:$0xff] %vm280_vm1, %v510_v61  ;;  %v1390_v62 = vpop.f32.mrb[9].mxu1 }
 0x507   :  { %v513_v63 = vpop.f32.mrb[10].mxu1 }
 0x508   :  { %518 = vst.msk [vmem:[#allocation19 + $0x8] sm:$0xff] %vm280_vm1, %v513_v63  ;;  %v1391_v1 = vpop.f32.mrb[11].mxu1 }
 0x50d   :  { %v519_v2 = vld [vmem:[#allocation19] sm:$0xff] }
 0x50e   :  { %v1233_v4 = vclamps-f32 %v519_v2, 16.118095 }
 0x50f   :  { %v520_v5 = vld [vmem:[#allocation19 + $0x8] sm:$0xff] }
 0x510   :  { %v527_v7 = vadd.f32 %v1233_v4, %v525_v3  ;;  %v1234_v8 = vclamps-f32 %v520_v5, 16.118095 }
 0x512   :  { %v529_v9 = vmul.f32 4.0, %v527_v7  ;;  %v528_v10 = vadd.f32 %v1234_v8, %v526_v6 }
 0x514   :  { %v531_v11 = vmul.f32 0.5, %v529_v9  ;;  %v530_v12 = vmul.f32 4.0, %v528_v10 }
 0x516   :  { %1554 = vtanh.f32 %v531_v11  ;;  %v532_v13 = vmul.f32 0.5, %v530_v12 }
 0x518   :  { %1556 = vtanh.f32 %v532_v13 }
 0x520   :  { %v1555_v14 = vpop.eup %1554 }
 0x521   :  { %v535_v16 = vadd.f32 1.0, %v1555_v14 }
 0x522   :  { %v1557_v17 = vpop.eup %1556 }
 0x523   :  { %v537_v18 = vmul.f32 0.5, %v535_v16  ;;  %v536_v19 = vadd.f32 1.0, %v1557_v17  ;;  %v1546_v17 = vld [vmem:[#allocation13] sm:$0xff]  }
 0x525   :  { %v541_v20 = vsel %vm280_vm1, %v537_v18, 0.0  ;;  %539 = vst.msk [vmem:[#allocation2] sm:$0xff] %vm280_vm1, %v537_v18  ;;  %v538_v21 = vmul.f32 0.5, %v536_v19  ;;  %v764_v24 = vpop.f32.mrb[12].mxu1  ;;  %v1547_v18 = vld [vmem:[#allocation13 + $0x8] sm:$0xff]   ;;  %v1548_v19 = vld [vmem:[#allocation13 + $0x10] sm:$0xff]  }
 0x526   :  { %542 = vadd.xlane.f32.xlu0 %v541_v20  ;;  %v1430_v25 = vpop.f32.mrb[13].mxu1  ;;  %v1549_v20 = vld [vmem:[#allocation13 + $0x18] sm:$0xff]  }
 0x527   :  { %540 = vst.msk [vmem:[#allocation2 + $0x8] sm:$0xff] %vm280_vm1, %v538_v21  ;;  %v544_v22 = vsel %vm280_vm1, %v538_v21, 0.0  ;;  %v767_v32 = vpop.f32.mrb[14].mxu1  ;;  %v1550_v21 = vld [vmem:[#allocation13 + $0x20] sm:$0xff]  }
 0x528   :  { %v1431_v33 = vpop.f32.mrb[15].mxu1 }
 0x529   :  { %v996_v33 = vmul.f32 0.5, %v2112_v46 }
 0x52a   :  { %545 = vadd.xlane.f32.xlu0 %v544_v22  ;;  %v1551_v22 = vld [vmem:[#allocation13 + $0x28] sm:$0xff]  }
 0x52c   :  { %v558_v52 = vld [vmem:[#allocation2] sm:$0xff] }
 0x52e   :  { %v559_v51 = vld [vmem:[#allocation2 + $0x8] sm:$0xff] }
 0x52f   :  { %v560_v53 = vpack.c.bf16 %v559_v51, %v558_v52 }
 0x5b3   :  { %v543_v26 = vpop.xlane.xlu0 %542 }
 0x5b4   :  { %548 = vst.msk [vmem:[#allocation3] sm:$0xff] %vm547_vm2, %v543_v26 }
 0x5b7   :  { %v546_v27 = vpop.xlane.xlu0 %545 }
 0x5b8   :  { %549 = vst.msk [vmem:[#allocation3 + $0x8] sm:$0xff] %vm547_vm2, %v546_v27 }
 0x5bb   :  { %v550_v28 = vld [vmem:[#allocation3] sm:$0xff] }
 0x5bc   :  { %1558 = vrsqrt.f32 %v550_v28  ;;  %vm552_vm3 = vcmp.gt.f32.partialorder %v550_v28, 0.0 }
 0x5bf   :  { %v551_v29 = vld [vmem:[#allocation3 + $0x8] sm:$0xff] }
 0x5c0   :  { %1560 = vrsqrt.f32 %v551_v29  ;;  %vm553_vm4 = vcmp.gt.f32.partialorder %v551_v29, 0.0  ;;  %v995_v29 = vmul.f32 0.5, %v2110_v44  ;;  %v1149_v44 = vlaneseq }
 0x5c6   :  { %v1559_v30 = vpop.eup %1558 }
 0x5c7   :  { %v556_v31 = vsel %vm552_vm3, %v1559_v30, 0.0 }
 0x5c8   :  { %773 = vperm.xlu1 %1502, %v556_v31  }
 0x5ca   :  { %v1561_v34 = vpop.eup %1560 }
 0x5cb   :  { %v557_v35 = vsel %vm553_vm4, %v1561_v34, 0.0 }
 0x5cc   :  { %778 = vperm.xlu1 %1502, %v557_v35  }
 0x647   :  { %v2145_v41 = vpop.permute.xlu1 %773 }
 0x648   :  { %v782_v43 = vmul.f32 %v2145_v41, %v764_v24  ;;  %v781_v47 = vmul.f32 %v2145_v41, %v2130_v57  ;;  %v1553_v24 = vld [vmem:[#allocation13 + $0x38] sm:$0xff]  }
 0x64b   :  { %v2147_v42 = vpop.permute.xlu1 %778 }
 0x64c   :  { %v784_v45 = vmul.f32 %v2147_v42, %v767_v32  ;;  %v783_v48 = vmul.f32 %v2147_v42, %v2132_v59 }
 0x64e   :  { %v786_v49 = vpack.c.bf16 %v784_v45, %v782_v43  ;;  %v785_v50 = vpack.c.bf16 %v783_v48, %v781_v47  ;;  %v1150_v43 = vand.u32 127, %v1149_v44 }
 0x650   :  { %790 = vmatprep.subr.bf16.mxu0 %v786_v49  ;;  %vm1151_vm5 = vcmp.lt.s32.totalorder %v1150_v43, 4 }
 0x651   :  { %791 = vmatpush1.bf16.msra.mxu0 %v785_v50 }
 0x652   :  { %1452 = vmatprep.subr.bf16.mxu0 %v1839_v0 }
 0x654   :  { %1251 = vmatmul.mubr.msk.bf16.vlgmr.msra.gmra.mrb[12].mxu0 %vm280_vm1, %v560_v53 }
 0x655   :  { %1454 = vmatprep.mubr.msk.bf16.mxu0 %vm1840_vm0, %v1839_v0 }
 0x727   :  { %v824_v57 = vpop.f32.mrb[12].mxu0 }
 0x728   :  { %v833_v58 = vmul.f32 %v824_v57, %v2145_v41  ;;  %v826_v59 = vpop.f32.mrb[13].mxu0 }
 0x729   :  { %v834_v60 = vmul.f32 %v826_v59, %v2145_v41  ;;  %v828_v61 = vpop.f32.mrb[14].mxu0 }
 0x72a   :  { %v837_v62 = vmax.f32 %v833_v58, 0.0  ;;  %v835_v63 = vmul.f32 %v828_v61, %v2147_v42  ;;  %v830_v1 = vpop.f32.mrb[15].mxu0 }
 0x72b   :  { %v839_v2 = vmax.f32 %v834_v60, 0.0  ;;  %v836_v3 = vmul.f32 %v830_v1, %v2147_v42 }
 0x72c   :  { %v838_v4 = vmax.f32 %v835_v63, 0.0 }
 0x72d   :  { %v841_v5 = vadd.f32 %v839_v2, %v837_v62  ;;  %v840_v6 = vmax.f32 %v836_v3, 0.0 }
 0x72f   :  { %v842_v7 = vadd.f32 %v840_v6, %v838_v4 }
 0x731   :  { %v859_v8 = vpack.c.bf16 %v842_v7, %v841_v5 }
 0x733   :  { %1449 = vmatmul.mubr.bf16.vlgmr.msra.gmra.mrb[16].mxu1 %v859_v8 }
 0x734   :  { %1480 = vmatprep.mubr.msk.bf16.mxu1 %vm1840_vm0, %v1839_v0 }
 0x806   :  { %v942_v9 = vpop.f32.mrb[16].mxu1 }
 0x807   :  { %v1450_v10 = vpop.f32.mrb[17].mxu1  ;;  %v949_v12 = vmul.f32 %v942_v9, %v2145_v41 }
 0x808   :  { %v945_v11 = vpop.f32.mrb[18].mxu1 }
 0x809   :  { %v950_v13 = vmul.f32 %v945_v11, %v2147_v42  ;;  %v1451_v14 = vpop.f32.mrb[19].mxu1 }
 0x80b   :  { %v951_v16 = vpack.c.bf16 %v950_v13, %v949_v12 }
 0x80d   :  { %1453 = vmatpush3.bf16.msra.mxu0 %v951_v16 }
 0x80e   :  { %1458 = vmatprep.subr.bf16.mxu0 %v1839_v0 }
 0x810   :  { %1455 = vmatmul.mubr.msk.bf16.vlgmr.msra.gmra.mrb[16].mxu0 %vm280_vm1, %v560_v53 }
 0x811   :  { %1459 = vmatpush3.bf16.msra.mxu0 %v1546_v17  ;;  %1474 = vmatprep.mubr.msk.bf16.mxu0 %vm1840_vm0, %v1839_v0 }
 0x812   :  { %1460 = vmatprep.subr.bf16.mxu0 %v1839_v0 }
 0x815   :  { %1461 = vmatpush3.bf16.msra.mxu0 %v1547_v18 }
 0x816   :  { %1462 = vmatprep.subr.bf16.mxu0 %v1839_v0 }
 0x819   :  { %1463 = vmatpush3.bf16.msra.mxu0 %v1548_v19 }
 0x81a   :  { %1464 = vmatprep.subr.bf16.mxu0 %v1839_v0 }
 0x81d   :  { %1465 = vmatpush3.bf16.msra.mxu0 %v1549_v20 }
 0x81e   :  { %1466 = vmatprep.subr.bf16.mxu0 %v1839_v0 }
 0x821   :  { %1467 = vmatpush3.bf16.msra.mxu0 %v1550_v21 }
 0x822   :  { %1468 = vmatprep.subr.bf16.mxu0 %v1839_v0 }
 0x825   :  { %1469 = vmatpush3.bf16.msra.mxu0 %v1551_v22 }
 0x826   :  { %1470 = vmatprep.subr.bf16.mxu0 %v1839_v0 }
 0x829   :  { %1471 = vmatpush3.bf16.msra.mxu0 %v1552_v23 }
 0x82a   :  { %1472 = vmatprep.subr.bf16.mxu0 %v1839_v0 }
 0x82d   :  { %1473 = vmatpush3.bf16.msra.mxu0 %v1553_v24 }
 0x8e3   :  { %v986_v25 = vpop.f32.mrb[16].mxu0 }
 0x8e4   :  { %v993_v26 = vmul.f32 %v986_v25, %v2145_v41  ;;  %v1456_v27 = vpop.f32.mrb[17].mxu0 }
 0x8e5   :  { %v989_v28 = vpop.f32.mrb[18].mxu0 }
 0x8e6   :  { %v997_v30 = vmul.f32 0.5, %v993_v26  ;;  %v994_v31 = vmul.f32 %v989_v28, %v2147_v42  ;;  %v1457_v32 = vpop.f32.mrb[19].mxu0 }
 0x8e8   :  { %v999_v34 = vadd.f32 %v997_v30, %v995_v29  ;;  %v998_v35 = vmul.f32 0.5, %v994_v31 }
 0x8ea   :  { %v1000_v36 = vadd.f32 %v998_v35, %v996_v33 }
 0x8ec   :  { %v1017_v37 = vpack.c.bf16 %v1000_v36, %v999_v34 }
 0x8ee   :  { %1475 = vmatmul.mubr.bf16.vlgmr.msra.gmra.mrb[20].mxu0 %v1017_v37 }
 0x9c1   :  { %v1100_v0 = vpop.f32.mrb[20].mxu0 }
 0x9c2   :  { %v1476_v38 = vpop.f32.mrb[21].mxu0 }
 0x9c3   :  { %v1103_v39 = vpop.f32.mrb[22].mxu0 }
 0x9c4   :  { %v1107_v40 = vpack.c.bf16 %v1103_v39, %v1100_v0  ;;  %v1477_v41 = vpop.f32.mrb[23].mxu0 }
 0x9c6   :  { %1479 = vmatpush3.bf16.msra.mxu1 %v1107_v40 }
 0x9c9   :  { %1481 = vmatmul.mubr.msk.bf16.vlgmr.msra.gmra.mrb[20].mxu1 %vm280_vm1, %v2081_v15 }
 0xa9c   :  { %v1142_v42 = vpop.f32.mrb[20].mxu1 }
 0xa9d   :  { %v1482_v45 = vpop.f32.mrb[21].mxu1  ;;  %v1152_v46 = vsel %vm1151_vm5, %v1142_v42, -1e+30 }
 0xa9e   :  { %1154 = vmax.xlane.f32.xlu0 %v1152_v46  ;;  %v1145_v47 = vpop.f32.mrb[22].mxu1 }
 0xa9f   :  { %v1153_v48 = vsel %vm1151_vm5, %v1145_v47, -1e+30  ;;  %v1483_v49 = vpop.f32.mrb[23].mxu1 }
 0xaa0   :  { %1156 = vmax.xlane.f32.xlu1 %v1153_v48 }
 0xb2b   :  { %v1155_v50 = vpop.xlane.xlu0 %1154 }
 0xb2c   :  { %v1158_v51 = vsub.f32 %v1152_v46, %v1155_v50 }
 0xb2d   :  { %v1157_v52 = vpop.xlane.xlu1 %1156 }
 0xb2e   :  { %v1160_v53 = vmul.f32 1.442695, %v1158_v51  ;;  %v1159_v54 = vsub.f32 %v1153_v48, %v1157_v52 }
 0xb30   :  { %1562 = vpow2.f32 %v1160_v53  ;;  %v1162_v55 = vmul.f32 1.442695, %v1159_v54 }
 0xb32   :  { %1564 = vpow2.f32 %v1162_v55 }
 0xb3a   :  { %v1563_v15 = vpop.eup %1562 }
 0xb3b   :  { %1164 = vadd.xlane.f32.xlu0 %v1563_v15 }
 0xb3c   :  { %v1565_v56 = vpop.eup %1564 }
 0xb3f   :  { %1166 = vadd.xlane.f32.xlu0 %v1565_v56 }
 0xb40   :  { %1779 = shalt.err (!%p1776_p6)
}
 0xb41   :  { %s1780_s1 = scalar_lea.hbm %s2226_s9, 256 }
 0xb42   :  { %p1781_p7 = scmp.ne.s32.totalorder %s2226_s9, %s1780_s1  ;;  %p1784_p8 = scmp.lt.u32.totalorder %s1780_s1, %s2226_s9 }
 0xb44   :  { %p1786_p9 = pnand %p1784_p8, %p1781_p7 }
 0xb46   :  { %1789 = shalt.err (!%p1786_p9)
}
 0xb47   :  { %1187 = dma.vmem_to_hbm [thread:$0]  %s1182_s25, 256, %s2226_s9, [#allocation6], %s1834_s0, %s1834_s0, %s1835_s23  }
 0xb48   :  { %s1843_s27 = smov [#allocation20]  }
 0xb49   :  { %s1193_s4 = sshll.u32 %s1843_s27, 4  ;;  %s1194_s4 = int_to_ptr.vmem [resolvable:$true] %s1193_s4 }
 0xb4a   :  { %s1790_s29 = scalar_lea.vmem %s1194_s4, 256  ;;  %p1795_p11 = scmp.lt.s32.totalorder %s1194_s4, %s1194_s4 }
 0xb4b   :  { %p1791_p10 = scmp.ne.s32.totalorder %s1194_s4, %s1790_s29  ;;  %p1796_p12 = scmp.lt.s32.totalorder %s1790_s29, %s1790_s29 }
 0xb4d   :  { %p1797_p13 = por %p1796_p12, %p1795_p11 }
 0xb4f   :  { %p1798_p0 = pnand %p1797_p13, %p1791_p10 }
 0xbc8   :  { %v1165_v57 = vpop.xlane.xlu0 %1164 }
 0xbc9   :  { %1566 = vlog2.f32 %v1165_v57 }
 0xbcc   :  { %v1167_v58 = vpop.xlane.xlu0 %1166 }
 0xbcd   :  { %1568 = vlog2.f32 %v1167_v58 }
 0xbd3   :  { %v1567_v59 = vpop.eup %1566 }
 0xbd4   :  { %v1169_v60 = vmul.f32 0.6931472, %v1567_v59 }
 0xbd6   :  { %v1172_v61 = vsub.f32 %v1158_v51, %v1169_v60 }
 0xbd7   :  { %v1569_v62 = vpop.eup %1568 }
 0xbd8   :  { %1174 = vst [vmem:[#allocation20] sm:$0xff] %v1172_v61  ;;  %v1171_v63 = vmul.f32 0.6931472, %v1569_v62 }
 0xbda   :  { %v1173_v1 = vsub.f32 %v1159_v54, %v1171_v63 }
 0xbdc   :  { %1175 = vst [vmem:[#allocation20 + $0x8] sm:$0xff] %v1173_v1 }
 0xbdd   :  { %1801 = shalt.err (!%p1798_p0)
}
 0xbde   :  { %s1802_s11 = scalar_lea.hbm %s2227_s10, 256 }
 0xbdf   :  { %p1803_p1 = scmp.ne.s32.totalorder %s2227_s10, %s1802_s11  ;;  %p1806_p2 = scmp.lt.u32.totalorder %s1802_s11, %s2227_s10 }
 0xbe1   :  { %p1808_p3 = pnand %p1806_p2, %p1803_p1 }
 0xbe3   :  { %1811 = shalt.err (!%p1808_p3)
}
 0xbe4   :  { %1199 = dma.vmem_to_hbm [thread:$0]  %s1194_s4, 256, %s2227_s10, [#allocation21], %s1834_s0, %s1834_s0, %s1835_s23  }
 0xbe5   :  { %1822 = dma.done.wait [#allocation6], 256  }
 0xbe6   :  { %1823 = vsyncadd [#allocation6], 4294967040 }
 0xbe7   :  { %1824 = dma.done.wait [#allocation21], 256  }
 0xbe8   :  { %1825 = vsyncadd [#allocation21], 4294967040 }
 0xbe9   :  { %1206 = vsyncpa [#allocation5], 1 }
 0xbea   :  { %1207 = vsyncpa [#allocation8], 1 }
 0xbeb   :  { %1208 = vsyncpa [#allocation11], 1 }
 0xbec   :  { %1209 = vsyncpa [#allocation14], 1 }
 0xbed   :  { %1210 = vsyncpa [#allocation17], 1 }
 0xbee   :  { %1211 = vsyncpa [#allocation6], 1 }
 0xbef   :  { %1212 = vsyncpa [#allocation21], 1 }

</bundles_post_ra>
